<compile_context>
chip_gen: v7x
topology: tpu7x:2x2x1
jax: 0.10.0
libtpu: 0.0.40
codegen_flags: <defaults>
</compile_context>

<pallas_src>
import jax
import jax.numpy as jnp
from jax.experimental import pallas as pl
from jax.experimental.pallas import tpu as pltpu


def _copy_kernel(x_ref, o_ref):
    # Identity copy of the current tile (VMEM -> VMEM).
    o_ref[...] = x_ref[...]


# Packed-sublane granularity per itemsize (f32 -> 8 rows, bf16 -> 16, int8 -> 32).
_SUBLANE = {4: 8, 2: 16, 1: 32}

_LANE = 128
_MAX_LANES = 4096              # 16 KiB per f32 row of a block
_TILE_BYTES_BUDGET = 2 << 20   # ~2 MiB per tile -> ~8 MiB live with 2x(in+out)


def _lane_dense_2d(n):
    """Factor n == R * C with C a large multiple of 128 when possible."""
    if n % _LANE == 0:
        m = n // _LANE
        k = 1
        for d in range(min(m, _MAX_LANES // _LANE), 0, -1):
            if m % d == 0:
                k = d
                break
        c = _LANE * k
        return n // c, c
    # Fallback (total size not 128-divisible): largest divisor of n <= _MAX_LANES.
    c = 1
    for d in range(min(n, _MAX_LANES), 0, -1):
        if n % d == 0:
            c = d
            break
    return n // c, c


def _pallas_identity_copy(x2d):
    """Tiled identity copy of a 2D array through a Pallas kernel (no pad/slice)."""
    R, C = x2d.shape
    dt = x2d.dtype
    itemsize = jnp.dtype(dt).itemsize
    sub = _SUBLANE.get(itemsize, 8)

    # Lane (last-dim) block: full extent when small, otherwise a big multiple
    # of 128; any ragged remainder is handled by the cdiv grid (masked edge).
    if C <= _LANE:
        tile_c = C
    else:
        tile_c = min((C // _LANE) * _LANE, _MAX_LANES)

    # Row block: dtype-aware multiple of the packed sublane count, capped so a
    # single tile stays within the per-tile byte budget.
    max_rows = max(sub, _TILE_BYTES_BUDGET // max(tile_c * itemsize, 1))
    if R <= sub:
        tile_r = R  # full extent (always legal)
    else:
        tile_r = min((R // sub) * sub, (max_rows // sub) * sub)
        tile_r = max(tile_r, sub)

    grid = (pl.cdiv(R, tile_r), pl.cdiv(C, tile_c))

    return pl.pallas_call(
        _copy_kernel,
        out_shape=jax.ShapeDtypeStruct((R, C), dt),
        grid_spec=pltpu.PrefetchScalarGridSpec(
            num_scalar_prefetch=0,
            grid=grid,
            in_specs=[pl.BlockSpec((tile_r, tile_c), lambda i, j: (i, j))],
            out_specs=pl.BlockSpec((tile_r, tile_c), lambda i, j: (i, j)),
        ),
        compiler_params=pltpu.CompilerParams(
            # Both axes are independent; on v7x the two TensorCores split them.
            dimension_semantics=("parallel", "parallel")
        ),
    )(x2d)


def unsqueeze(x, axis):
    """Pallas-backed equivalent of torch.unsqueeze(x, axis)."""
    ndim = x.ndim
    # torch allows axis in [-(ndim+1), ndim]
    if axis < 0:
        axis = axis + ndim + 1
    assert 0 <= axis <= ndim, f"axis {axis} out of range for ndim {ndim}"

    out_shape = x.shape[:axis] + (1,) + x.shape[axis:]

    if x.size == 0:
        # Nothing to copy; pure metadata change.
        return x.reshape(out_shape)

    # Lane-dense 2D view of the flattened data (reshape of a row-major array
    # is a free metadata op), then one tiled identity-copy kernel.
    R, C = _lane_dense_2d(x.size)
    y2d = _pallas_identity_copy(x.reshape(R, C))
    return y2d.reshape(out_shape)


if __name__ == "__main__":
    key = jax.random.PRNGKey(0)
    x = jax.random.normal(key, (2, 4, 16, 16), dtype=jnp.float32)

    axis = 1  # Unsqueeze(axis=1): (2, 4, 16, 16) -> (2, 1, 4, 16, 16)
    y = unsqueeze(x, axis)
    jax.block_until_ready(y)

    # Correctness checks against jnp.expand_dims (same semantics as torch).
    ref = jnp.expand_dims(x, axis)
    assert y.shape == ref.shape, (y.shape, ref.shape)
    assert y.dtype == ref.dtype
    assert bool(jnp.array_equal(y, ref))

    # Negative axis (torch allows axis in [-(ndim+1), ndim]).
    y_neg = unsqueeze(x, -1)
    jax.block_until_ready(y_neg)
    assert y_neg.shape == jnp.expand_dims(x, -1).shape
    assert bool(jnp.array_equal(y_neg, jnp.expand_dims(x, -1)))

    # Also exercise a bf16 input to check the dtype-aware (16,128) row tiling.
    xb = jax.random.normal(key, (4, 8, 32), dtype=jnp.bfloat16)
    yb = unsqueeze(xb, 0)
    jax.block_until_ready(yb)
    assert yb.shape == (1, 4, 8, 32)
    assert bool(jnp.array_equal(yb, jnp.expand_dims(xb, 0)))

    print("KERNEL_OK")
</pallas_src>

<mosaic_0001>
module attributes {stable_mosaic.version = 11 : i64} {
  func.func @_copy_kernel(%arg0: i32, %arg1: i32, %arg2: memref<1x2048xf32, #tpu.memory_space<vmem>>, %arg3: memref<1x2048xf32, #tpu.memory_space<vmem>>) attributes {dimension_semantics = [#tpu.dimension_semantics<parallel>, #tpu.dimension_semantics<parallel>], iteration_bounds = array<i64: 1, 1>, scalar_prefetch = 0 : i64, scratch_operands = 0 : i64, tpu.core_type = #tpu.core_type<tc>, window_params = [{transform_indices = @transform_0, window_bounds = array<i64: 1, 2048>}, {transform_indices = @transform_1, window_bounds = array<i64: 1, 2048>}]} {
    %c0 = arith.constant 0 : index
    %c0_0 = arith.constant 0 : index
    %0 = vector.load %arg2[%c0, %c0_0] : memref<1x2048xf32, #tpu.memory_space<vmem>>, vector<1x2048xf32>
    %c0_1 = arith.constant 0 : index
    %c0_2 = arith.constant 0 : index
    %1 = vector.load %arg3[%c0_1, %c0_2] : memref<1x2048xf32, #tpu.memory_space<vmem>>, vector<1x2048xf32>
    tpu.vector_store %arg3[%c0_1, %c0_2], %0 {strides = array<i32>} : memref<1x2048xf32, #tpu.memory_space<vmem>>, vector<1x2048xf32>,
    return
  }
  func.func @transform_0(%arg0: i32, %arg1: i32) -> (i32, i32) {
    %c0_i32 = arith.constant 0 : i32
    return %arg0, %arg1 : i32, i32
  }
  func.func @transform_1(%arg0: i32, %arg1: i32) -> (i32, i32) {
    %c0_i32 = arith.constant 0 : i32
    return %arg0, %arg1 : i32, i32
  }
}

</mosaic_0001>

<bundles_post_ra>
// kernel: tpu_custom_call.1
= control target key start
LH: loop header
LB: loop body
LE: loop exit
PB: predicated region body
PF: predicated region fallthrough
CT: control target
= control target key end

     0   :  { %6 = vsyncpa [#allocation3], 0  ;;  %s126_s0 = inlined_call_operand.hbm [shape: f32[1,2048], index: 0, kind: input, shape index: {}]   ;;  %s127_s1 = inlined_call_operand.hbm [shape: f32[1,2048], index: 1, kind: output, shape index: {}]  }
   0x1   :  { %7 = vsyncpa [#allocation4], 0  ;;  %s90_s6 = smov [#allocation2]   ;;  %s42_s10 = scalar_lea.hbm %s126_s0, 256 }
   0x2   :  { %s14_s7 = sshll.u32 %s90_s6, 4  ;;  %p43_p0 = scmp.ne.s32.totalorder %s126_s0, %s42_s10  ;;  %s15_s7 = int_to_ptr.vmem [resolvable:$true] %s14_s7 }
   0x3   :  { %p46_p1 = scmp.lt.u32.totalorder %s42_s10, %s126_s0 }
   0x5   :  { %p48_p2 = pnand %p46_p1, %p43_p0 }
   0x7   :  { %51 = shalt.err (!%p48_p2)
}
   0x8   :  { %s52_s15 = scalar_lea.vmem %s15_s7, 256  ;;  %p57_p4 = scmp.lt.s32.totalorder %s15_s7, %s15_s7 }
   0x9   :  { %p53_p3 = scmp.ne.s32.totalorder %s15_s7, %s52_s15  ;;  %p58_p5 = scmp.lt.s32.totalorder %s52_s15, %s52_s15 }
   0xb   :  { %p59_p6 = por %p58_p5, %p57_p4 }
   0xd   :  { %p60_p7 = pnand %p59_p6, %p53_p3 }
   0xf   :  { %63 = shalt.err (!%p60_p7)
}
  0x10   :  { %17 = dma.hbm_to_vmem [thread:$0]  %s126_s0, 256, %s15_s7, [#allocation3]  }
  0x11   :  { %86 = dma.done.wait [#allocation3], 256  }
  0x12   :  { %87 = vsyncadd [#allocation3], 4294967040  ;;  %s91_s18 = smov [#allocation5]   ;;  %v21_v0 = vld [vmem:[#allocation2] sm:$0xff]  ;;  %v22_v1 = vld [vmem:[#allocation2 + $0x8] sm:$0xff] }
  0x13   :  { %s31_s19 = sshll.u32 %s91_s18, 4  ;;  %23 = vst [vmem:[#allocation5] sm:$0xff] %v21_v0  ;;  %24 = vst [vmem:[#allocation5 + $0x8] sm:$0xff] %v22_v1  ;;  %s32_s19 = int_to_ptr.vmem [resolvable:$true] %s31_s19 }
  0x14   :  { %s64_s20 = scalar_lea.vmem %s32_s19, 256  ;;  %p69_p9 = scmp.lt.s32.totalorder %s32_s19, %s32_s19 }
  0x15   :  { %p65_p8 = scmp.ne.s32.totalorder %s32_s19, %s64_s20  ;;  %p70_p10 = scmp.lt.s32.totalorder %s64_s20, %s64_s20 }
  0x17   :  { %p71_p11 = por %p70_p10, %p69_p9 }
  0x19   :  { %p72_p12 = pnand %p71_p11, %p65_p8 }
  0x1b   :  { %75 = shalt.err (!%p72_p12)
}
  0x1c   :  { %s76_s0 = scalar_lea.hbm %s127_s1, 256 }
  0x1d   :  { %p77_p13 = scmp.ne.s32.totalorder %s127_s1, %s76_s0  ;;  %p80_p0 = scmp.lt.u32.totalorder %s76_s0, %s127_s1 }
  0x1f   :  { %p82_p1 = pnand %p80_p0, %p77_p13 }
  0x21   :  { %85 = shalt.err (!%p82_p1)
}
  0x22   :  { %34 = dma.vmem_to_hbm [thread:$0]  %s32_s19, 256, %s127_s1, [#allocation4]  }
  0x23   :  { %88 = dma.done.wait [#allocation4], 256  }
  0x24   :  { %89 = vsyncadd [#allocation4], 4294967040 }
  0x25   :  { %38 = vsyncpa [#allocation3], 1 }
  0x26   :  { %39 = vsyncpa [#allocation4], 1 }

</bundles_post_ra>
